<compile_context>
chip_gen: v6e
topology: v6e:2x2x1
jax: 0.10.0
libtpu: 0.0.40
codegen_flags: <defaults>
</compile_context>

<pallas_src>
import jax
import jax.numpy as jnp
from jax.experimental import pallas as pl
from jax.experimental.pallas import tpu as pltpu

HIDDEN = 32        # real hidden dim
HIDDEN_PAD = 128   # padded hidden dim (lane-dense)
N_OUT = 6          # real output dim
OUT_PAD = 128      # padded output dim (lane-dense)
D_IN = 512


def emission_kernel(x_ref, w1_ref, b1_ref, w2_ref, b2_ref, o_ref):
    # dense1 (MXU, f32 accumulate) + bias + ReLU -- all lane-dense at width 128.
    h = jnp.dot(x_ref[...], w1_ref[...], preferred_element_type=jnp.float32)
    h = jnp.maximum(h + b1_ref[...], 0.0)
    # dense2 (K=128, N=128 padded) + bias; padded lanes stay exactly zero.
    y = jnp.dot(h, w2_ref[...], preferred_element_type=jnp.float32)
    o_ref[...] = y + b2_ref[...]


def emission_net(x, w1, b1, w2, b2, *, block_b=1024, compute_dtype=jnp.float32):
    """x: (B, 512) f32 -> (B, 6) f32.

    w1: (512, 32), b1: (32,), w2: (32, 6), b2: (6,)  (pre-transposed Linear
    weights, i.e. torch weight.T).  compute_dtype=jnp.bfloat16 casts the x/W1
    stream (f32 accumulate) for ~2x memory-roofline on v6e/v7x.
    """
    B = x.shape[0]

    # --- batch tiling: TB multiple of 8, pad B up to a multiple of TB ---------
    # TB = 1024 keeps the double-buffered x tile (2 x 2 MiB f32) + out tile
    # (2 x 0.5 MiB) + resident params (~0.3 MiB) far under the scoped VMEM
    # default on every chip, while amortizing the ~0.35 us per-grid-step cost.
    tb = min(block_b, max(8, ((B + 7) // 8) * 8))
    b_pad = ((B + tb - 1) // tb) * tb
    if b_pad != B:
        x = jnp.pad(x, ((0, b_pad - B), (0, 0)))

    # --- lane-dense zero padding of the tiny parameter tensors ---------------
    w1p = jnp.pad(w1, ((0, 0), (0, HIDDEN_PAD - w1.shape[1])))
    b1p = jnp.pad(b1.reshape(1, -1), ((0, 0), (0, HIDDEN_PAD - b1.shape[-1])))
    w2p = jnp.pad(w2, ((0, HIDDEN_PAD - w2.shape[0]), (0, OUT_PAD - w2.shape[1])))
    b2p = jnp.pad(b2.reshape(1, -1), ((0, 0), (0, OUT_PAD - b2.shape[-1])))

    if compute_dtype != jnp.float32:
        # halve HBM traffic on the dominant x stream; accumulate stays f32.
        x = x.astype(compute_dtype)
        w1p = w1p.astype(compute_dtype)

    grid = (b_pad // tb,)

    # Advisory cost hint for XLA's scheduler: memory-bound, dominated by x.
    x_bytes = b_pad * D_IN * jnp.dtype(x.dtype).itemsize
    param_bytes = (w1p.size * jnp.dtype(w1p.dtype).itemsize
                   + (b1p.size + w2p.size + b2p.size) * 4)
    out_bytes = b_pad * OUT_PAD * 4
    cost = pl.CostEstimate(
        flops=2 * b_pad * (D_IN * HIDDEN_PAD + HIDDEN_PAD * OUT_PAD),
        transcendentals=0,
        bytes_accessed=x_bytes + param_bytes + out_bytes,
    )

    out = pl.pallas_call(
        emission_kernel,
        out_shape=jax.ShapeDtypeStruct((b_pad, OUT_PAD), jnp.float32),
        grid=grid,
        in_specs=[
            pl.BlockSpec((tb, D_IN), lambda i: (i, 0)),            # x tile (streamed)
            pl.BlockSpec((D_IN, HIDDEN_PAD), lambda i: (0, 0)),    # W1 (resident)
            pl.BlockSpec((1, HIDDEN_PAD), lambda i: (0, 0)),       # b1 (resident)
            pl.BlockSpec((HIDDEN_PAD, OUT_PAD), lambda i: (0, 0)), # W2 (resident)
            pl.BlockSpec((1, OUT_PAD), lambda i: (0, 0)),          # b2 (resident)
        ],
        out_specs=pl.BlockSpec((tb, OUT_PAD), lambda i: (i, 0)),
        compiler_params=pltpu.CompilerParams(
            dimension_semantics=("parallel",),   # megacore on v7x; no-op v5e/v6e
        ),
        cost_estimate=cost,
    )(x, w1p, b1p, w2p, b2p)

    return out[:B, :N_OUT]


def init_params(key):
    """Parameters matching EmissionNet.__init__ (weights stored as (in, out))."""
    k1, k2 = jax.random.split(key)
    bound1 = 1.0 / jnp.sqrt(float(D_IN))
    w1 = jax.random.uniform(k1, (D_IN, HIDDEN), jnp.float32, -bound1, bound1)
    b1 = jax.random.uniform(k2, (HIDDEN,), jnp.float32, -bound1, bound1)
    # dense2: weight zeroed, bias set explicitly, per the PyTorch module.
    w2 = jnp.zeros((HIDDEN, N_OUT), jnp.float32)
    b2 = jnp.array([1.0, 0.0, 0.0, 0.0, 1.0, 0.0], jnp.float32)
    return w1, b1, w2, b2


def _reference(x, w1, b1, w2, b2):
    return jnp.maximum(x @ w1 + b1, 0.0) @ w2 + b2


if __name__ == "__main__":
    key = jax.random.PRNGKey(0)
    k_x, k_p, k_w2 = jax.random.split(key, 3)

    B = 16
    x = jax.random.normal(k_x, (B, D_IN), jnp.float32)
    w1, b1, w2, b2 = init_params(k_p)

    # --- 1) exact module semantics (W2 = 0, bias = [1,0,0,0,1,0]), f32 path ---
    out = jax.block_until_ready(emission_net(x, w1, b1, w2, b2))
    ref = _reference(x, w1, b1, w2, b2)
    assert out.shape == (B, N_OUT)
    assert jnp.allclose(out, ref, atol=1e-5, rtol=1e-5)

    # --- 2) nonzero W2 so the second matmul's numerics are exercised ----------
    w2_t = jax.random.uniform(k_w2, (HIDDEN, N_OUT), jnp.float32,
                              -1.0 / jnp.sqrt(float(HIDDEN)),
                              1.0 / jnp.sqrt(float(HIDDEN)))
    out_t = jax.block_until_ready(emission_net(x, w1, b1, w2_t, b2))
    ref_t = _reference(x, w1, b1, w2_t, b2)
    assert jnp.allclose(out_t, ref_t, atol=1e-5, rtol=1e-5)

    # --- 3) bf16 x/W1 stream (v6e/v7x memory-roofline config), f32 accumulate -
    out_bf = jax.block_until_ready(
        emission_net(x, w1, b1, w2_t, b2, compute_dtype=jnp.bfloat16))
    x_r = x.astype(jnp.bfloat16).astype(jnp.float32)
    w1_r = w1.astype(jnp.bfloat16).astype(jnp.float32)
    ref_bf = _reference(x_r, w1_r, b1, w2_t, b2)
    assert jnp.allclose(out_bf, ref_bf, atol=1e-3, rtol=1e-3)

    # --- 4) batch not a multiple of the tile (exercises batch padding) --------
    xb = jax.random.normal(k_x, (13, D_IN), jnp.float32)
    out_b = jax.block_until_ready(emission_net(xb, w1, b1, w2_t, b2))
    assert out_b.shape == (13, N_OUT)
    assert jnp.allclose(out_b, _reference(xb, w1, b1, w2_t, b2),
                        atol=1e-5, rtol=1e-5)

    print("KERNEL_OK")
</pallas_src>

<mosaic_0001>
module attributes {stable_mosaic.version = 11 : i64} {
  func.func @emission_kernel(%arg0: i32, %arg1: memref<16x512xf32, #tpu.memory_space<vmem>>, %arg2: memref<512x128xf32, #tpu.memory_space<vmem>>, %arg3: memref<1x128xf32, #tpu.memory_space<vmem>>, %arg4: memref<128x128xf32, #tpu.memory_space<vmem>>, %arg5: memref<1x128xf32, #tpu.memory_space<vmem>>, %arg6: memref<16x128xf32, #tpu.memory_space<vmem>>) attributes {dimension_semantics = [#tpu.dimension_semantics<parallel>], iteration_bounds = array<i64: 1>, scalar_prefetch = 0 : i64, scratch_operands = 0 : i64, tpu.core_type = #tpu.core_type<tc>, window_params = [{transform_indices = @transform_0, window_bounds = array<i64: 16, 512>}, {pipeline_mode = #tpu.pipeline_mode<synchronous>, transform_indices = @transform_1, window_bounds = array<i64: 512, 128>}, {pipeline_mode = #tpu.pipeline_mode<synchronous>, transform_indices = @transform_2, window_bounds = array<i64: 1, 128>}, {pipeline_mode = #tpu.pipeline_mode<synchronous>, transform_indices = @transform_3, window_bounds = array<i64: 128, 128>}, {pipeline_mode = #tpu.pipeline_mode<synchronous>, transform_indices = @transform_4, window_bounds = array<i64: 1, 128>}, {transform_indices = @transform_5, window_bounds = array<i64: 16, 128>}]} {
    %c0 = arith.constant 0 : index
    %c0_0 = arith.constant 0 : index
    %0 = vector.load %arg1[%c0, %c0_0] : memref<16x512xf32, #tpu.memory_space<vmem>>, vector<16x512xf32>
    %c0_1 = arith.constant 0 : index
    %c0_2 = arith.constant 0 : index
    %1 = vector.load %arg2[%c0_1, %c0_2] : memref<512x128xf32, #tpu.memory_space<vmem>>, vector<512x128xf32>
    %cst = arith.constant dense<0.000000e+00> : vector<16x128xf32>
    %2 = tpu.matmul %0, %1, %cst {dimension_numbers = #tpu.dot_dimension_numbers<[1], [0], [0], [1], [0, 0, 1, 1], [], []>} : vector<16x512xf32>, vector<512x128xf32>, vector<16x128xf32> -> vector<16x128xf32>
    %c0_3 = arith.constant 0 : index
    %c0_4 = arith.constant 0 : index
    %3 = vector.load %arg3[%c0_3, %c0_4] : memref<1x128xf32, #tpu.memory_space<vmem>>, vector<1x128xf32>
    %4 = vector.broadcast %3 : vector<1x128xf32> to vector<16x128xf32>
    %5 = arith.addf %2, %4 : vector<16x128xf32>
    %cst_5 = arith.constant 0.000000e+00 : f32
    %6 = vector.broadcast %cst_5 : f32 to vector<16x128xf32>
    %7 = arith.maximumf %5, %6 : vector<16x128xf32>
    %c0_6 = arith.constant 0 : index
    %c0_7 = arith.constant 0 : index
    %8 = vector.load %arg4[%c0_6, %c0_7] : memref<128x128xf32, #tpu.memory_space<vmem>>, vector<128x128xf32>
    %cst_8 = arith.constant dense<0.000000e+00> : vector<16x128xf32>
    %9 = tpu.matmul %7, %8, %cst_8 {dimension_numbers = #tpu.dot_dimension_numbers<[1], [0], [0], [1], [0, 0, 1, 1], [], []>} : vector<16x128xf32>, vector<128x128xf32>, vector<16x128xf32> -> vector<16x128xf32>
    %c0_9 = arith.constant 0 : index
    %c0_10 = arith.constant 0 : index
    %10 = vector.load %arg5[%c0_9, %c0_10] : memref<1x128xf32, #tpu.memory_space<vmem>>, vector<1x128xf32>
    %11 = vector.broadcast %10 : vector<1x128xf32> to vector<16x128xf32>
    %12 = arith.addf %9, %11 : vector<16x128xf32>
    %c0_11 = arith.constant 0 : index
    %c0_12 = arith.constant 0 : index
    %13 = vector.load %arg6[%c0_11, %c0_12] : memref<16x128xf32, #tpu.memory_space<vmem>>, vector<16x128xf32>
    tpu.vector_store %arg6[%c0_11, %c0_12], %12 {strides = array<i32>} : memref<16x128xf32, #tpu.memory_space<vmem>>, vector<16x128xf32>,
    return
  }
  func.func @transform_0(%arg0: i32) -> (i32, i32) {
    %c0_i32 = arith.constant 0 : i32
    %c0_i32_0 = arith.constant 0 : i32
    return %arg0, %c0_i32 : i32, i32
  }
  func.func @transform_1(%arg0: i32) -> (i32, i32) {
    %c0_i32 = arith.constant 0 : i32
    %c0_i32_0 = arith.constant 0 : i32
    %c0_i32_1 = arith.constant 0 : i32
    return %c0_i32, %c0_i32_0 : i32, i32
  }
  func.func @transform_2(%arg0: i32) -> (i32, i32) {
    %c0_i32 = arith.constant 0 : i32
    %c0_i32_0 = arith.constant 0 : i32
    %c0_i32_1 = arith.constant 0 : i32
    return %c0_i32, %c0_i32_0 : i32, i32
  }
  func.func @transform_3(%arg0: i32) -> (i32, i32) {
    %c0_i32 = arith.constant 0 : i32
    %c0_i32_0 = arith.constant 0 : i32
    %c0_i32_1 = arith.constant 0 : i32
    return %c0_i32, %c0_i32_0 : i32, i32
  }
  func.func @transform_4(%arg0: i32) -> (i32, i32) {
    %c0_i32 = arith.constant 0 : i32
    %c0_i32_0 = arith.constant 0 : i32
    %c0_i32_1 = arith.constant 0 : i32
    return %c0_i32, %c0_i32_0 : i32, i32
  }
  func.func @transform_5(%arg0: i32) -> (i32, i32) {
    %c0_i32 = arith.constant 0 : i32
    %c0_i32_0 = arith.constant 0 : i32
    return %arg0, %c0_i32 : i32, i32
  }
}

</mosaic_0001>

<bundles_post_ra>
// kernel: tpu_custom_call.1
= control target key start
LH: loop header
LB: loop body
LE: loop exit
PB: predicated region body
PF: predicated region fallthrough
CT: control target
= control target key end

     0   :  { %10 = vsyncpa [#allocation3], 0  ;;  %s701_s0 = inlined_call_operand.hbm [shape: f32[16,512], index: 0, kind: input, shape index: {}]   ;;  %s702_s1 = inlined_call_operand.hbm [shape: f32[512,128], index: 1, kind: input, shape index: {}]   ;;  %s703_s2 = inlined_call_operand.vmem [shape: f32[1,128], index: 2, kind: input, shape index: {}]   ;;  %s704_s3 = inlined_call_operand.hbm [shape: f32[128,128], index: 3, kind: input, shape index: {}]   ;;  %s705_s4 = inlined_call_operand.vmem [shape: f32[1,128], index: 4, kind: input, shape index: {}]   ;;  %s706_s5 = inlined_call_operand.hbm [shape: f32[16,128], index: 5, kind: output, shape index: {}]  }
   0x1   :  { %11 = vsyncpa [#allocation6], 0 }
   0x2   :  { %12 = vsyncpa [#allocation4], 0  ;;  %s636_s18 = smov [#allocation5]  }
   0x3   :  { %s30_s19 = sshll.u32 %s636_s18, 4  ;;  %s31_s19 = int_to_ptr.vmem [resolvable:$true] %s30_s19 }
   0x4   :  { %s558_s20 = scalar_lea.vmem %s31_s19, 8192  ;;  %p563_p1 = scmp.lt.s32.totalorder %s31_s19, %s31_s19 }
   0x5   :  { %p559_p0 = scmp.ne.s32.totalorder %s31_s19, %s558_s20  ;;  %p564_p2 = scmp.lt.s32.totalorder %s558_s20, %s558_s20 }
   0x7   :  { %p565_p3 = por %p564_p2, %p563_p1 }
   0x9   :  { %p566_p4 = pnand %p565_p3, %p559_p0 }
   0xb   :  { %569 = shalt.err (!%p566_p4)
}
   0xc   :  { %s637_s21 = smov 128   ;;  %s638_s22 = smov 8  }
   0xd   :  { %36 = dma.hbm_to_vmem [thread:$0]  %s702_s1, 8192, %s31_s19, [#allocation6], %s637_s21, %s637_s21, %s638_s22  }
   0xe   :  { %s639_s25 = smov [#allocation2]  }
   0xf   :  { %s18_s26 = sshll.u32 %s639_s25, 4  ;;  %s19_s26 = int_to_ptr.vmem [resolvable:$true] %s18_s26 }
  0x10   :  { %s578_s27 = scalar_lea.vmem %s19_s26, 1024  ;;  %p583_p6 = scmp.lt.s32.totalorder %s19_s26, %s19_s26 }
  0x11   :  { %p579_p5 = scmp.ne.s32.totalorder %s19_s26, %s578_s27  ;;  %p584_p7 = scmp.lt.s32.totalorder %s578_s27, %s578_s27 }
  0x13   :  { %p585_p8 = por %p584_p7, %p583_p6 }
  0x15   :  { %p586_p9 = pnand %p585_p8, %p579_p5 }
  0x17   :  { %589 = shalt.err (!%p586_p9)
}
  0x18   :  { %s640_s28 = smov 512   ;;  %s641_s29 = smov 32  }
  0x19   :  { %24 = dma.hbm_to_vmem [thread:$0]  %s701_s0, 1024, %s19_s26, [#allocation3], %s640_s28, %s640_s28, %s641_s29  }
  0x1a   :  { %s642_s7 = smov [#allocation7]  }
  0x1b   :  { %s44_s8 = sshll.u32 %s642_s7, 4  ;;  %s45_s8 = int_to_ptr.vmem [resolvable:$true] %s44_s8 }
  0x1c   :  { %s598_s1 = scalar_lea.vmem %s45_s8, 2048  ;;  %p603_p11 = scmp.lt.s32.totalorder %s45_s8, %s45_s8 }
  0x1d   :  { %p599_p10 = scmp.ne.s32.totalorder %s45_s8, %s598_s1  ;;  %p604_p12 = scmp.lt.s32.totalorder %s598_s1, %s598_s1 }
  0x1f   :  { %p605_p13 = por %p604_p12, %p603_p11 }
  0x21   :  { %p606_p0 = pnand %p605_p13, %p599_p10 }
  0x23   :  { %609 = shalt.err (!%p606_p0)
}
  0x24   :  { %50 = dma.hbm_to_vmem [thread:$0]  %s704_s3, 2048, %s45_s8, [#allocation6], %s637_s21, %s637_s21, %s638_s22  }
  0x25   :  { %630 = dma.done.wait [#allocation3], 1024  }
  0x26   :  { %631 = vsyncadd [#allocation3], 4294966272 }
  0x27   :  { %632 = dma.done.wait [#allocation6], 10240  }
  0x28   :  { %633 = vsyncadd [#allocation6], 4294957056  ;;  %v101_v0 = vld [vmem:[#allocation5 + $0xf8] sm:$0xff]  ;;  %v100_v4 = vld [vmem:[#allocation5 + $0xf0] sm:$0xff]  ;;  %s643_s12 = smov [#allocation8]  }
  0x29   :  { %v133_v1 = vld [vmem:[#allocation5 + $0x1f8] sm:$0xff]  ;;  %413 = vmatprep.subr.mxu0 %v101_v0  ;;  %v132_v5 = vld [vmem:[#allocation5 + $0x1f0] sm:$0xff]  ;;  %v99_v8 = vld [vmem:[#allocation5 + $0xe8] sm:$0xff]  ;;  %s398_s13 = sshll.u32 %s643_s12, 4  ;;  %s399_s13 = int_to_ptr.vmem [resolvable:$true] %s398_s13 }
  0x2a   :  { %v85_v2 = vld [vmem:[#allocation5 + $0x78] sm:$0xff]  ;;  %451 = vmatprep.subr.mxu1 %v133_v1  ;;  %v84_v6 = vld [vmem:[#allocation5 + $0x70] sm:$0xff]  ;;  %v131_v9 = vld [vmem:[#allocation5 + $0x1e8] sm:$0xff]  ;;  %s610_s14 = scalar_lea.vmem %s399_s13, 256  ;;  %p615_p2 = scmp.lt.s32.totalorder %s399_s13, %s399_s13 }
  0x2b   :  { %v117_v3 = vld [vmem:[#allocation5 + $0x178] sm:$0xff]  ;;  %414 = vmatpush3.msra.mxu0 %v85_v2  ;;  %v116_v7 = vld [vmem:[#allocation5 + $0x170] sm:$0xff]  ;;  %v83_v10 = vld [vmem:[#allocation5 + $0x68] sm:$0xff]  ;;  %p611_p1 = scmp.ne.s32.totalorder %s399_s13, %s610_s14  ;;  %p616_p3 = scmp.lt.s32.totalorder %s610_s14, %s610_s14 }
  0x2c   :  { %452 = vmatpush3.msra.mxu1 %v117_v3  ;;  %415 = vmatprep.subr.mxu0 %v100_v4  ;;  %v115_v11 = vld [vmem:[#allocation5 + $0x168] sm:$0xff]  ;;  %v98_v12 = vld [vmem:[#allocation5 + $0xe0] sm:$0xff]  ;;  %v97_v16 = vld [vmem:[#allocation5 + $0xd8] sm:$0xff] }
  0x2d   :  { %453 = vmatprep.subr.mxu1 %v132_v5  ;;  %416 = vmatpush3.msra.mxu0 %v84_v6  ;;  %v130_v13 = vld [vmem:[#allocation5 + $0x1e0] sm:$0xff]  ;;  %v129_v17 = vld [vmem:[#allocation5 + $0x1d8] sm:$0xff]  ;;  %v96_v20 = vld [vmem:[#allocation5 + $0xd0] sm:$0xff]  ;;  %p617_p4 = por %p616_p3, %p615_p2 }
  0x2e   :  { %454 = vmatpush3.msra.mxu1 %v116_v7  ;;  %417 = vmatprep.subr.mxu0 %v99_v8  ;;  %v82_v14 = vld [vmem:[#allocation5 + $0x60] sm:$0xff]  ;;  %v81_v18 = vld [vmem:[#allocation5 + $0x58] sm:$0xff]  ;;  %v128_v21 = vld [vmem:[#allocation5 + $0x1d0] sm:$0xff] }
  0x2f   :  { %455 = vmatprep.subr.mxu1 %v131_v9  ;;  %v114_v15 = vld [vmem:[#allocation5 + $0x160] sm:$0xff]  ;;  %418 = vmatpush3.msra.mxu0 %v83_v10  ;;  %v113_v19 = vld [vmem:[#allocation5 + $0x158] sm:$0xff]  ;;  %v80_v22 = vld [vmem:[#allocation5 + $0x50] sm:$0xff]  ;;  %p618_p5 = pnand %p617_p4, %p611_p1 }
  0x30   :  { %456 = vmatpush3.msra.mxu1 %v115_v11  ;;  %419 = vmatprep.subr.mxu0 %v98_v12  ;;  %v112_v23 = vld [vmem:[#allocation5 + $0x150] sm:$0xff]  ;;  %v95_v24 = vld [vmem:[#allocation5 + $0xc8] sm:$0xff]  ;;  %v94_v28 = vld [vmem:[#allocation5 + $0xc0] sm:$0xff] }
  0x31   :  { %457 = vmatprep.subr.mxu1 %v130_v13  ;;  %420 = vmatpush3.msra.mxu0 %v82_v14  ;;  %v127_v25 = vld [vmem:[#allocation5 + $0x1c8] sm:$0xff]  ;;  %v126_v29 = vld [vmem:[#allocation5 + $0x1c0] sm:$0xff]  ;;  %v93_v32 = vld [vmem:[#allocation5 + $0xb8] sm:$0xff] }
  0x32   :  { %458 = vmatpush3.msra.mxu1 %v114_v15  ;;  %421 = vmatprep.subr.mxu0 %v97_v16  ;;  %v79_v26 = vld [vmem:[#allocation5 + $0x48] sm:$0xff]  ;;  %v78_v30 = vld [vmem:[#allocation5 + $0x40] sm:$0xff]  ;;  %v125_v33 = vld [vmem:[#allocation5 + $0x1b8] sm:$0xff] }
  0x33   :  { %459 = vmatprep.subr.mxu1 %v129_v17  ;;  %422 = vmatpush3.msra.mxu0 %v81_v18  ;;  %v111_v27 = vld [vmem:[#allocation5 + $0x148] sm:$0xff]  ;;  %v110_v31 = vld [vmem:[#allocation5 + $0x140] sm:$0xff]  ;;  %v77_v34 = vld [vmem:[#allocation5 + $0x38] sm:$0xff] }
  0x34   :  { %460 = vmatpush3.msra.mxu1 %v113_v19  ;;  %423 = vmatprep.subr.mxu0 %v96_v20  ;;  %v109_v35 = vld [vmem:[#allocation5 + $0x138] sm:$0xff]  ;;  %v92_v36 = vld [vmem:[#allocation5 + $0xb0] sm:$0xff]  ;;  %v91_v40 = vld [vmem:[#allocation5 + $0xa8] sm:$0xff] }
  0x35   :  { %461 = vmatprep.subr.mxu1 %v128_v21  ;;  %424 = vmatpush3.msra.mxu0 %v80_v22  ;;  %v124_v37 = vld [vmem:[#allocation5 + $0x1b0] sm:$0xff]  ;;  %v123_v41 = vld [vmem:[#allocation5 + $0x1a8] sm:$0xff]  ;;  %v90_v44 = vld [vmem:[#allocation5 + $0xa0] sm:$0xff] }
  0x36   :  { %462 = vmatpush3.msra.mxu1 %v112_v23  ;;  %425 = vmatprep.subr.mxu0 %v95_v24  ;;  %v76_v38 = vld [vmem:[#allocation5 + $0x30] sm:$0xff]  ;;  %v75_v42 = vld [vmem:[#allocation5 + $0x28] sm:$0xff]  ;;  %v122_v45 = vld [vmem:[#allocation5 + $0x1a0] sm:$0xff] }
  0x37   :  { %463 = vmatprep.subr.mxu1 %v127_v25  ;;  %426 = vmatpush3.msra.mxu0 %v79_v26  ;;  %v108_v39 = vld [vmem:[#allocation5 + $0x130] sm:$0xff]  ;;  %v107_v43 = vld [vmem:[#allocation5 + $0x128] sm:$0xff]  ;;  %v74_v46 = vld [vmem:[#allocation5 + $0x20] sm:$0xff] }
  0x38   :  { %464 = vmatpush3.msra.mxu1 %v111_v27  ;;  %427 = vmatprep.subr.mxu0 %v94_v28  ;;  %v106_v47 = vld [vmem:[#allocation5 + $0x120] sm:$0xff]  ;;  %v89_v48 = vld [vmem:[#allocation5 + $0x98] sm:$0xff]  ;;  %v88_v52 = vld [vmem:[#allocation5 + $0x90] sm:$0xff] }
  0x39   :  { %465 = vmatprep.subr.mxu1 %v126_v29  ;;  %428 = vmatpush3.msra.mxu0 %v78_v30  ;;  %v121_v49 = vld [vmem:[#allocation5 + $0x198] sm:$0xff]  ;;  %v120_v53 = vld [vmem:[#allocation5 + $0x190] sm:$0xff]  ;;  %v87_v56 = vld [vmem:[#allocation5 + $0x88] sm:$0xff] }
  0x3a   :  { %466 = vmatpush3.msra.mxu1 %v110_v31  ;;  %429 = vmatprep.subr.mxu0 %v93_v32  ;;  %v73_v50 = vld [vmem:[#allocation5 + $0x18] sm:$0xff]  ;;  %v72_v54 = vld [vmem:[#allocation5 + $0x10] sm:$0xff]  ;;  %v119_v57 = vld [vmem:[#allocation5 + $0x188] sm:$0xff] }
  0x3b   :  { %467 = vmatprep.subr.mxu1 %v125_v33  ;;  %430 = vmatpush3.msra.mxu0 %v77_v34  ;;  %v105_v51 = vld [vmem:[#allocation5 + $0x118] sm:$0xff]  ;;  %v104_v55 = vld [vmem:[#allocation5 + $0x110] sm:$0xff]  ;;  %v71_v58 = vld [vmem:[#allocation5 + $0x8] sm:$0xff] }
  0x3c   :  { %468 = vmatpush3.msra.mxu1 %v109_v35  ;;  %431 = vmatprep.subr.mxu0 %v92_v36  ;;  %v103_v59 = vld [vmem:[#allocation5 + $0x108] sm:$0xff]  ;;  %v86_v60 = vld [vmem:[#allocation5 + $0x80] sm:$0xff]  ;;  %v65_v1 = vld [vmem:[#allocation2 + $0x18] sm:$0xff] }
  0x3d   :  { %469 = vmatprep.subr.mxu1 %v124_v37  ;;  %432 = vmatpush3.msra.mxu0 %v76_v38  ;;  %v118_v61 = vld [vmem:[#allocation5 + $0x180] sm:$0xff]  ;;  %v63_v63 = vld [vmem:[#allocation2 + $0x8] sm:$0xff]  ;;  %v64_v3 = vld [vmem:[#allocation2 + $0x10] sm:$0xff] }
  0x3e   :  { %470 = vmatpush3.msra.mxu1 %v108_v39  ;;  %433 = vmatprep.subr.mxu0 %v91_v40  ;;  %v70_v62 = vld [vmem:[#allocation5] sm:$0xff]  ;;  %v67_v4 = vld [vmem:[#allocation2 + $0x28] sm:$0xff]  ;;  %v69_v5 = vld [vmem:[#allocation2 + $0x38] sm:$0xff] }
  0x3f   :  { %471 = vmatprep.subr.mxu1 %v123_v41  ;;  %434 = vmatpush3.msra.mxu0 %v75_v42  ;;  %v102_v0 = vld [vmem:[#allocation5 + $0x100] sm:$0xff]  ;;  %v308_v6 = vld [vmem:[#allocation7 + $0x78] sm:$0xff]  ;;  %v68_v8 = vld [vmem:[#allocation2 + $0x30] sm:$0xff] }
  0x40   :  { %472 = vmatpush3.msra.mxu1 %v107_v43  ;;  %435 = vmatprep.subr.mxu0 %v90_v44  ;;  %v62_v2 = vld [vmem:[#allocation2] sm:$0xff]  ;;  %v307_v9 = vld [vmem:[#allocation7 + $0x70] sm:$0xff]  ;;  %v306_v10 = vld [vmem:[#allocation7 + $0x68] sm:$0xff] }
  0x41   :  { %473 = vmatprep.subr.mxu1 %v122_v45  ;;  %436 = vmatpush3.msra.mxu0 %v74_v46  ;;  %v66_v7 = vld [vmem:[#allocation2 + $0x20] sm:$0xff]  ;;  %v304_v12 = vld [vmem:[#allocation7 + $0x58] sm:$0xff]  ;;  %v303_v13 = vld [vmem:[#allocation7 + $0x50] sm:$0xff] }
  0x42   :  { %474 = vmatpush3.msra.mxu1 %v106_v47  ;;  %437 = vmatprep.subr.mxu0 %v89_v48  ;;  %v305_v11 = vld [vmem:[#allocation7 + $0x60] sm:$0xff]  ;;  %v302_v14 = vld [vmem:[#allocation7 + $0x48] sm:$0xff]  ;;  %v300_v16 = vld [vmem:[#allocation7 + $0x38] sm:$0xff] }
  0x43   :  { %475 = vmatprep.subr.mxu1 %v121_v49  ;;  %438 = vmatpush3.msra.mxu0 %v73_v50  ;;  %v301_v15 = vld [vmem:[#allocation7 + $0x40] sm:$0xff]  ;;  %v299_v17 = vld [vmem:[#allocation7 + $0x30] sm:$0xff]  ;;  %v298_v18 = vld [vmem:[#allocation7 + $0x28] sm:$0xff] }
  0x44   :  { %476 = vmatpush3.msra.mxu1 %v105_v51  ;;  %439 = vmatprep.subr.mxu0 %v88_v52  ;;  %v297_v19 = vld [vmem:[#allocation7 + $0x20] sm:$0xff]  ;;  %v296_v20 = vld [vmem:[#allocation7 + $0x18] sm:$0xff]  ;;  %v295_v21 = vld [vmem:[#allocation7 + $0x10] sm:$0xff] }
  0x45   :  { %477 = vmatprep.subr.mxu1 %v120_v53  ;;  %440 = vmatpush3.msra.mxu0 %v72_v54  ;;  %v294_v22 = vld [vmem:[#allocation7 + $0x8] sm:$0xff]  ;;  %v293_v23 = vld [vmem:[#allocation7] sm:$0xff] }
  0x46   :  { %478 = vmatpush3.msra.mxu1 %v104_v55  ;;  %441 = vmatprep.subr.mxu0 %v87_v56  ;;  %v411_v26 = vld [vmem:[%s703_s2] ss:$0 sm:$0xff] }
  0x47   :  { %479 = vmatprep.subr.mxu1 %v119_v57  ;;  %442 = vmatpush3.msra.mxu0 %v71_v58  ;;  %v412_v43 = vld [vmem:[%s705_s4] ss:$0 sm:$0xff] }
  0x48   :  { %480 = vmatpush3.msra.mxu1 %v103_v59  ;;  %443 = vmatprep.subr.mxu0 %v86_v60 }
  0x49   :  { %481 = vmatprep.subr.mxu1 %v118_v61  ;;  %444 = vmatpush3.msra.mxu0 %v70_v62 }
  0x4a   :  { %205 = vmatprep.mubr.f32.mxu0 %v63_v63  ;;  %482 = vmatpush3.msra.mxu1 %v102_v0 }
  0x4b   :  { %280 = vmatprep.mubr.f32.mxu1 %v65_v1  ;;  %206 = vmatmul.mubr.f32.vlgmr.msra.gmra.mxu0 %v62_v2 }
  0x4c   :  { %281 = vmatmul.mubr.f32.vlgmr.msra.gmra.mxu1 %v64_v3  ;;  %210 = vmatprep.mubr.f32.mxu0 %v67_v4 }
  0x4d   :  { %285 = vmatprep.mubr.f32.mxu1 %v69_v5  ;;  %507 = vmatprep.subr.mxu0 %v308_v6 }
  0x4e   :  { %508 = vmatpush3.msra.mxu0 %v308_v6 }
  0x4f   :  { %211 = vmatmul.mubr.f32.gmra.mxu0 %v66_v7  ;;  %509 = vmatprep.subr.mxu0 %v307_v9 }
  0x50   :  { %286 = vmatmul.mubr.f32.gmra.mxu1 %v68_v8  ;;  %510 = vmatpush3.msra.mxu0 %v307_v9 }
  0x51   :  { %511 = vmatprep.subr.mxu0 %v306_v10 }
  0x52   :  { %512 = vmatpush3.msra.mxu0 %v306_v10 }
  0x53   :  { %513 = vmatprep.subr.mxu0 %v305_v11 }
  0x54   :  { %514 = vmatpush3.msra.mxu0 %v305_v11 }
  0x55   :  { %515 = vmatprep.subr.mxu0 %v304_v12 }
  0x56   :  { %516 = vmatpush3.msra.mxu0 %v304_v12 }
  0x57   :  { %517 = vmatprep.subr.mxu0 %v303_v13 }
  0x58   :  { %518 = vmatpush3.msra.mxu0 %v303_v13 }
  0x59   :  { %519 = vmatprep.subr.mxu0 %v302_v14 }
  0x5a   :  { %520 = vmatpush3.msra.mxu0 %v302_v14 }
  0x5b   :  { %521 = vmatprep.subr.mxu0 %v301_v15 }
  0x5c   :  { %522 = vmatpush3.msra.mxu0 %v301_v15 }
  0x5d   :  { %523 = vmatprep.subr.mxu0 %v300_v16 }
  0x5e   :  { %524 = vmatpush3.msra.mxu0 %v300_v16 }
  0x5f   :  { %525 = vmatprep.subr.mxu0 %v299_v17 }
  0x60   :  { %526 = vmatpush3.msra.mxu0 %v299_v17 }
  0x61   :  { %527 = vmatprep.subr.mxu0 %v298_v18 }
  0x62   :  { %528 = vmatpush3.msra.mxu0 %v298_v18 }
  0x63   :  { %529 = vmatprep.subr.mxu0 %v297_v19 }
  0x64   :  { %530 = vmatpush3.msra.mxu0 %v297_v19 }
  0x65   :  { %531 = vmatprep.subr.mxu0 %v296_v20 }
  0x66   :  { %532 = vmatpush3.msra.mxu0 %v296_v20 }
  0x67   :  { %533 = vmatprep.subr.mxu0 %v295_v21 }
  0x68   :  { %534 = vmatpush3.msra.mxu0 %v295_v21 }
  0x69   :  { %535 = vmatprep.subr.mxu0 %v294_v22 }
  0x6a   :  { %536 = vmatpush3.msra.mxu0 %v294_v22 }
  0x6b   :  { %537 = vmatprep.subr.mxu0 %v293_v23 }
  0x6c   :  { %538 = vmatpush3.msra.mxu0 %v293_v23 }
 0x10b   :  { %v445_v24 = vpop.f32.mrf.mxu0 }
 0x10c   :  { %v483_v25 = vpop.f32.mrf.mxu1 }
 0x10d   :  { %v446_v27 = vpop.f32.mrf.mxu0 }
 0x10e   :  { %v484_v28 = vpop.f32.mrf.mxu1  ;;  %v447_v29 = vadd.f32 %v446_v27, %v445_v24 }
 0x10f   :  { %v448_v30 = vpop.f32.mrf.mxu0  ;;  %v485_v33 = vadd.f32 %v484_v28, %v483_v25 }
 0x110   :  { %v486_v31 = vpop.f32.mrf.mxu1  ;;  %v208_v32 = vadd.f32 %v447_v29, %v411_v26 }
 0x111   :  { %v449_v34 = vpop.f32.mrf.mxu0 }
 0x112   :  { %v487_v35 = vpop.f32.mrf.mxu1  ;;  %v283_v36 = vadd.f32 %v485_v33, %v208_v32  ;;  %v450_v37 = vadd.f32 %v449_v34, %v448_v30 }
 0x113   :  { %v488_v40 = vadd.f32 %v487_v35, %v486_v31 }
 0x114   :  { %v291_v38 = vmax.f32 %v283_v36, 0.0  ;;  %v213_v39 = vadd.f32 %v450_v37, %v411_v26 }
 0x116   :  { %v288_v41 = vadd.f32 %v488_v40, %v213_v39  ;;  %539 = vmatprep.mubr.f32.mxu0 %v291_v38 }
 0x118   :  { %v292_v42 = vmax.f32 %v288_v41, 0.0 }
 0x11a   :  { %540 = vmatmul.mubr.f32.vlgmr.msra.gmra.mxu0 %v292_v42 }
 0x1da   :  { %v541_v44 = vpop.f32.mrf.mxu0 }
 0x1db   :  { %v388_v45 = vadd.f32 %v541_v44, %v412_v43 }
 0x1dc   :  { %v382_v46 = vpop.f32.mrf.mxu0 }
 0x1dd   :  { %392 = vst [vmem:[#allocation8 + $0x8] sm:$0xff] %v388_v45  ;;  %v383_v47 = vadd.f32 %v412_v43, %v382_v46 }
 0x1df   :  { %391 = vst [vmem:[#allocation8] sm:$0xff] %v383_v47 }
 0x1e0   :  { %621 = shalt.err (!%p618_p5)
}
 0x1e1   :  { %404 = dma.vmem_to_hbm [thread:$0]  %s399_s13, 256, %s706_s5, [#allocation4], %s637_s21, %s637_s21, %s638_s22  }
 0x1e2   :  { %634 = dma.done.wait [#allocation4], 256  }
 0x1e3   :  { %635 = vsyncadd [#allocation4], 4294967040 }
 0x1e4   :  { %408 = vsyncpa [#allocation3], 1 }
 0x1e5   :  { %409 = vsyncpa [#allocation6], 1 }
 0x1e6   :  { %410 = vsyncpa [#allocation4], 1 }

</bundles_post_ra>
